<compile_context>
chip_gen: v7x
topology: tpu7x:2x2x1
jax: 0.10.0
libtpu: 0.0.40
codegen_flags: <defaults>
</compile_context>

<pallas_src>
import jax
import jax.numpy as jnp
from jax.experimental import pallas as pl
from jax.experimental.pallas import tpu as pltpu

_LANE = 128
_SUBLANE = 8
_FAST_PATH_ROWS = 4096   # below this, XLA's fused gemm beats pallas_call launch cost
_TM_CAP = 16384          # rows per tile; bf16 x tile => ~8 MiB double-buffered (v7x-safe)


def _round_up(x: int, m: int) -> int:
    return ((x + m - 1) // m) * m


def _choose_tile_m(M: int) -> int:
    """Pick the M tile: full extent if it fits, else a 128-multiple with an even grid."""
    if M <= _TM_CAP:
        return M  # single full-extent block (block shape == array dims is always legal)
    steps = pl.cdiv(M, _TM_CAP)
    if steps % 2 == 1:
        steps += 1  # even grid -> balanced split across v7x's two TensorCores
    return _round_up(pl.cdiv(M, steps), _LANE)


def _vmem_budget_bytes(TM: int, E: int, O: int, stream_itemsize: int) -> int:
    """VMEM need with (8,128) lane/sublane padding, double-buffered, + headroom."""
    x_blk = TM * _round_up(E, _LANE) * stream_itemsize            # lane-padded x tile
    o_blk = _round_up(O, _SUBLANE) * TM * 4                       # sublane-padded (O,TM) f32
    w_blk = _round_up(O, _SUBLANE) * _round_up(E, _LANE) * stream_itemsize
    b_blk = _round_up(O, _SUBLANE) * _LANE * 4
    total = 2 * (x_blk + o_blk + w_blk + b_blk)                   # double buffering
    # 2x headroom, floor 16 MiB, cap 48 MiB (under v7x's 64 MiB physical VMEM/TC)
    return int(min(48 * 2**20, max(16 * 2**20, 2 * total)))


def _linear_kernel(x_ref, wt_ref, b_ref, o_ref):
    # x_ref : (TM, E)  bf16 activation tile (rows of the flattened (M, E) slab)
    # wt_ref: (O, E)   bf16 weight in PyTorch (out, in) layout; VMEM-resident
    # b_ref : (O, 1)   f32 bias column; VMEM-resident
    # o_ref : (O, TM)  f32 transposed output tile -> lane-dense stores along TM
    acc = jax.lax.dot_general(
        wt_ref[...],
        x_ref[...],
        dimension_numbers=(((1,), (1,)), ((), ())),  # contract E on both (trans_b)
        preferred_element_type=jnp.float32,
    )
    o_ref[...] = (acc + b_ref[...]).astype(o_ref.dtype)


def hyponly_forward(x, w, b, *, compute_dtype=jnp.bfloat16, force_pallas=False):
    """x: (N, S, E) f32; w: (E, O) f32 (= PyTorch W.T); b: (O,) f32 -> (N, S, O) f32."""
    N, S, E = x.shape
    O = w.shape[1]
    M = N * S

    x2d = x.reshape(M, E)

    # Fast path: tiny M -> pallas_call launch + wrapper transpose cost more than
    # the gemm itself; XLA's fused gemm wins on all generations.
    if M < _FAST_PATH_ROWS and not force_pallas:
        return (x2d @ w + b).reshape(N, S, O)

    # bf16 stream for the dominant x read (ideally the upstream producer already
    # emits bf16 so this cast fuses away); accumulation stays f32 on the MXU.
    xk = x2d.astype(compute_dtype)
    wt = w.T.astype(compute_dtype)            # (O, E) PyTorch (out, in) layout
    bcol = b.reshape(O, 1).astype(jnp.float32)

    TM = _choose_tile_m(M)
    grid_m = pl.cdiv(M, TM)
    itemsize = jnp.dtype(compute_dtype).itemsize

    cost = pl.CostEstimate(
        flops=2 * M * E * O,
        transcendentals=0,
        bytes_accessed=(M * E + E * O) * itemsize + 4 * (O + M * O),
    )

    out_t = pl.pallas_call(
        _linear_kernel,
        out_shape=jax.ShapeDtypeStruct((O, M), jnp.float32),
        grid=(grid_m,),
        in_specs=[
            pl.BlockSpec((TM, E), lambda i: (i, 0)),   # stream large x tiles over M
            pl.BlockSpec((O, E), lambda i: (0, 0)),    # weight resident in VMEM
            pl.BlockSpec((O, 1), lambda i: (0, 0)),    # bias resident in VMEM
        ],
        out_specs=pl.BlockSpec((O, TM), lambda i: (0, i)),  # lane-dense along M
        compiler_params=pltpu.CompilerParams(
            dimension_semantics=("parallel",),               # megacore-shardable M axis
            vmem_limit_bytes=_vmem_budget_bytes(TM, E, O, itemsize),
        ),
        cost_estimate=cost,
    )(xk, wt, bcol)

    # (O, M) -> (M, O) -> (N, S, O); the transpose touches only M*O*4 bytes.
    return out_t.T.reshape(N, S, O)


if __name__ == "__main__":
    # Nominal small shapes for the module: batch=2, seq=8, d_embed=32, d_output=3
    num_examples, seq_len, d_embed, d_output = 2, 8, 32, 3

    key = jax.random.PRNGKey(0)
    kx, kw, kb, kx2 = jax.random.split(key, 4)

    x = jax.random.normal(kx, (num_examples, seq_len, d_embed), dtype=jnp.float32)

    # Deterministic parameter init mimicking nn.Linear's uniform(-1/sqrt(fan_in), +)
    bound = 1.0 / jnp.sqrt(jnp.float32(d_embed))
    w_pt = jax.random.uniform(kw, (d_output, d_embed), minval=-bound, maxval=bound,
                              dtype=jnp.float32)  # PyTorch layout (out, in)
    b = jax.random.uniform(kb, (d_output,), minval=-bound, maxval=bound,
                           dtype=jnp.float32)
    w = w_pt.T  # kernel-facing layout (in, out)

    ref = x @ w + b

    # 1) Nominal tiny shape: fast path (plain XLA gemm), exact f32 parity.
    out_fast = jax.block_until_ready(hyponly_forward(x, w, b))
    assert out_fast.shape == (num_examples, seq_len, d_output)
    assert jnp.allclose(out_fast, ref, atol=1e-5, rtol=1e-5)

    # 2) Same tiny shape, forced through the Pallas kernel (bf16 stream, f32 acc).
    out_k = jax.block_until_ready(hyponly_forward(x, w, b, force_pallas=True))
    assert out_k.shape == (num_examples, seq_len, d_output)
    assert jnp.allclose(out_k, ref, atol=2e-2, rtol=2e-2)

    # 3) Larger M (still small data, ~1 MiB) that exercises the real Pallas path.
    n2, s2 = 64, 128  # M = 8192 rows >= fast-path threshold
    x2 = jax.random.normal(kx2, (n2, s2, d_embed), dtype=jnp.float32)
    out2 = jax.block_until_ready(hyponly_forward(x2, w, b))
    ref2 = x2 @ w + b
    assert out2.shape == (n2, s2, d_output)
    assert jnp.allclose(out2, ref2, atol=2e-2, rtol=2e-2)

    print("KERNEL_OK")
</pallas_src>

<mosaic_0001>
module attributes {stable_mosaic.version = 11 : i64} {
  func.func @_linear_kernel(%arg0: i32, %arg1: memref<16x32xbf16, #tpu.memory_space<vmem>>, %arg2: memref<3x32xbf16, #tpu.memory_space<vmem>>, %arg3: memref<3x1xf32, #tpu.memory_space<vmem>>, %arg4: memref<3x16xf32, #tpu.memory_space<vmem>>) attributes {dimension_semantics = [#tpu.dimension_semantics<parallel>], iteration_bounds = array<i64: 1>, scalar_prefetch = 0 : i64, scratch_operands = 0 : i64, tpu.core_type = #tpu.core_type<tc>, window_params = [{transform_indices = @transform_0, window_bounds = array<i64: 16, 32>}, {pipeline_mode = #tpu.pipeline_mode<synchronous>, transform_indices = @transform_1, window_bounds = array<i64: 3, 32>}, {pipeline_mode = #tpu.pipeline_mode<synchronous>, transform_indices = @transform_2, window_bounds = array<i64: 3, 1>}, {transform_indices = @transform_3, window_bounds = array<i64: 3, 16>}]} {
    %c0 = arith.constant 0 : index
    %c0_0 = arith.constant 0 : index
    %0 = vector.load %arg2[%c0, %c0_0] : memref<3x32xbf16, #tpu.memory_space<vmem>>, vector<3x32xbf16>
    %c0_1 = arith.constant 0 : index
    %c0_2 = arith.constant 0 : index
    %1 = vector.load %arg1[%c0_1, %c0_2] : memref<16x32xbf16, #tpu.memory_space<vmem>>, vector<16x32xbf16>
    %cst = arith.constant dense<0.000000e+00> : vector<3x16xf32>
    %2 = tpu.matmul %0, %1, %cst {dimension_numbers = #tpu.dot_dimension_numbers<[1], [1], [0], [0], [0, 0, 1, 0], [], []>} : vector<3x32xbf16>, vector<16x32xbf16>, vector<3x16xf32> -> vector<3x16xf32>
    %c0_3 = arith.constant 0 : index
    %c0_4 = arith.constant 0 : index
    %3 = vector.load %arg3[%c0_3, %c0_4] : memref<3x1xf32, #tpu.memory_space<vmem>>, vector<3x1xf32>
    %4 = vector.broadcast %3 : vector<3x1xf32> to vector<3x16xf32>
    %5 = arith.addf %2, %4 : vector<3x16xf32>
    %c0_5 = arith.constant 0 : index
    %c0_6 = arith.constant 0 : index
    %6 = vector.load %arg4[%c0_5, %c0_6] : memref<3x16xf32, #tpu.memory_space<vmem>>, vector<3x16xf32>
    tpu.vector_store %arg4[%c0_5, %c0_6], %5 {strides = array<i32>} : memref<3x16xf32, #tpu.memory_space<vmem>>, vector<3x16xf32>,
    return
  }
  func.func @transform_0(%arg0: i32) -> (i32, i32) {
    %c0_i32 = arith.constant 0 : i32
    %c0_i32_0 = arith.constant 0 : i32
    return %arg0, %c0_i32 : i32, i32
  }
  func.func @transform_1(%arg0: i32) -> (i32, i32) {
    %c0_i32 = arith.constant 0 : i32
    %c0_i32_0 = arith.constant 0 : i32
    %c0_i32_1 = arith.constant 0 : i32
    return %c0_i32, %c0_i32_0 : i32, i32
  }
  func.func @transform_2(%arg0: i32) -> (i32, i32) {
    %c0_i32 = arith.constant 0 : i32
    %c0_i32_0 = arith.constant 0 : i32
    %c0_i32_1 = arith.constant 0 : i32
    return %c0_i32, %c0_i32_0 : i32, i32
  }
  func.func @transform_3(%arg0: i32) -> (i32, i32) {
    %c0_i32 = arith.constant 0 : i32
    %c0_i32_0 = arith.constant 0 : i32
    return %c0_i32, %arg0 : i32, i32
  }
}

</mosaic_0001>

<bundles_post_ra>
// kernel: tpu_custom_call.1
= control target key start
LH: loop header
LB: loop body
LE: loop exit
PB: predicated region body
PF: predicated region fallthrough
CT: control target
= control target key end

     0   :  { %8 = vsyncpa [#allocation3], 0  ;;  %s232_s0 = inlined_call_operand.hbm [shape: bf16[16,32], index: 0, kind: input, shape index: {}]   ;;  %s233_s1 = inlined_call_operand.vmem [shape: bf16[3,32], index: 1, kind: input, shape index: {}]   ;;  %s234_s2 = inlined_call_operand.vmem [shape: f32[3,1], index: 2, kind: input, shape index: {}]   ;;  %s235_s3 = inlined_call_operand.hbm [shape: f32[3,16], index: 3, kind: output, shape index: {}]  }
   0x1   :  { %9 = vsyncpa [#allocation4], 0  ;;  %s175_s12 = smov [#allocation2]   ;;  %s127_s16 = scalar_lea.hbm %s232_s0, 128 }
   0x2   :  { %s15_s13 = sshll.u32 %s175_s12, 4  ;;  %p128_p0 = scmp.ne.s32.totalorder %s232_s0, %s127_s16  ;;  %s16_s13 = int_to_ptr.vmem [resolvable:$true] %s15_s13 }
   0x3   :  { %p131_p1 = scmp.lt.u32.totalorder %s127_s16, %s232_s0 }
   0x5   :  { %p133_p2 = pnand %p131_p1, %p128_p0 }
   0x7   :  { %136 = shalt.err (!%p133_p2)
}
   0x8   :  { %s137_s21 = scalar_lea.vmem %s16_s13, 128  ;;  %p142_p4 = scmp.lt.s32.totalorder %s16_s13, %s16_s13 }
   0x9   :  { %p138_p3 = scmp.ne.s32.totalorder %s16_s13, %s137_s21  ;;  %p143_p5 = scmp.lt.s32.totalorder %s137_s21, %s137_s21 }
   0xb   :  { %p144_p6 = por %p143_p5, %p142_p4 }
   0xd   :  { %p145_p7 = pnand %p144_p6, %p138_p3 }
   0xf   :  { %148 = shalt.err (!%p145_p7)
}
  0x10   :  { %s176_s22 = smov 64   ;;  %s177_s23 = smov 4  }
  0x11   :  { %21 = dma.hbm_to_vmem [thread:$0]  %s232_s0, 128, %s16_s13, [#allocation3], %s176_s22, %s176_s22, %s177_s23  }
  0x12   :  { %171 = dma.done.wait [#allocation3], 128  }
  0x13   :  { %172 = vsyncadd [#allocation3], 4294967168  ;;  %v178_v0 = vmov 0.0   ;;  %vm179_vm0 = vmmov 0   ;;  %v180_v1 = vmov 0   ;;  %vm44_vm1 = vcmask 261120  }
  0x14   :  { %112 = vmatprep.subr.bf16.mxu0 %v178_v0  ;;  %114 = vmatprep.mubr.msk.bf16.mxu0 %vm179_vm0, %v178_v0  ;;  %v126_v2 = vld [vmem:[#allocation2] sm:$0xff]   ;;  %s181_s0 = smov [#allocation5]   ;;  %vm91_vm2 = vcmask 124928  }
  0x15   :  { %125 = vset.pattern.permute.xlu0 %v180_v1  ;;  %v33_v3 = vld [vmem:[%s234_s2] sm:$0x7]  ;;  %v49_v4 = vsel %vm44_vm1, %v126_v2, 0  ;;  %s99_s30 = sshll.u32 %s181_s0, 4  ;;  %s100_s30 = int_to_ptr.vmem [resolvable:$true] %s99_s30 }
  0x16   :  { %36 = vperm.xlu0 %125, %v33_v3   ;;  %113 = vmatpush3.bf16.xpose.msra.mxu0 %v49_v4  ;;  %v30_v5 = vld [vmem:[%s233_s1] sm:$0x3]  ;;  %s149_s2 = scalar_lea.vmem %s100_s30, 64  ;;  %p154_p9 = scmp.lt.s32.totalorder %s100_s30, %s100_s30 }
  0x17   :  { %p150_p8 = scmp.ne.s32.totalorder %s100_s30, %s149_s2  ;;  %p155_p10 = scmp.lt.s32.totalorder %s149_s2, %s149_s2 }
  0x19   :  { %p156_p11 = por %p155_p10, %p154_p9 }
  0x1b   :  { %p157_p12 = pnand %p156_p11, %p150_p8 }
  0x1d   :  { %115 = vmatmul.mubr.msk.bf16.vlgmr.msra.gmra.mrb[0].mxu0 %vm44_vm1, %v30_v5 }
  0x95   :  { %v37_v6 = vpop.permute.xlu0 %36 }
  0xf0   :  { %v85_v7 = vpop.f32.mrb[0].mxu0 }
  0xf1   :  { %v86_v8 = vadd.f32 %v85_v7, %v37_v6  ;;  %v116_v9 = vpop.f32.mrb[1].mxu0 }
  0xf2   :  { %v88_v10 = vpop.f32.mrb[2].mxu0 }
  0xf3   :  { %v117_v11 = vpop.f32.mrb[3].mxu0  ;;  %92 = vst.msk [vmem:[#allocation5] sm:$0x7] %vm91_vm2, %v86_v8 }
  0xf4   :  { %160 = shalt.err (!%p157_p12)
}
  0xf5   :  { %s161_s5 = scalar_lea.hbm %s235_s3, 64 }
  0xf6   :  { %p162_p13 = scmp.ne.s32.totalorder %s235_s3, %s161_s5  ;;  %p165_p0 = scmp.lt.u32.totalorder %s161_s5, %s235_s3 }
  0xf8   :  { %p167_p1 = pnand %p165_p0, %p162_p13 }
  0xfa   :  { %170 = shalt.err (!%p167_p1)
}
  0xfb   :  { %102 = dma.vmem_to_hbm [thread:$0]  %s100_s30, 64, %s235_s3, [#allocation4]  }
  0xfc   :  { %173 = dma.done.wait [#allocation4], 64  }
  0xfd   :  { %174 = vsyncadd [#allocation4], 4294967232 }
  0xfe   :  { %106 = vsyncpa [#allocation3], 1 }
  0xff   :  { %107 = vsyncpa [#allocation4], 1 }

</bundles_post_ra>
